<compile_context>
chip_gen: v6e
topology: v6e:2x2x1
jax: 0.10.0
libtpu: 0.0.40
codegen_flags: <defaults>
</compile_context>

<pallas_src>
import functools

import jax
import jax.numpy as jnp
from jax.experimental import pallas as pl
from jax.experimental.pallas import tpu as pltpu


def _fused_forward_kernel(ids_ref, pos_ref, emb_ref, rev_ref, bias_ref, out_ref,
                          *, BL, D, K, V, Vr, OUTW):
    """Fused VirtualEmbedding + ReverseEmbedding forward.

    ids_ref  : VMEM [(1+K)*BL, 1] int32   token ids then synonym ids (k-major blocks)
    pos_ref  : VMEM [BL, BL]      f32     constant: pos[t,s]=1 iff s//L == t%L
                                           (folds the i_sum group-sum + broadcast)
    emb_ref  : VMEM [V, D]        f32     VirtualEmbedding weight
    rev_ref  : VMEM [D, Vr]       f32     ReverseEmbedding weight, first D rows
    bias_ref : VMEM [1, Vr]       f32     padding-row @ rev_weight[D:]  (precomputed)
    out_ref  : VMEM [BL, OUTW]    f32     [:, :D]=symbol_from_synonyms, [:, D:D+Vr]=recovered
    """
    R = (1 + K) * BL

    # ---- one-hot gather on the MXU (f32 one-hot: v7x MXU has no integer path) ----
    ids_col = ids_ref[...]                                     # [R, 1] int32
    iota_v = jax.lax.broadcasted_iota(jnp.int32, (R, V), 1)    # [R, V]
    onehot = (iota_v == ids_col).astype(jnp.float32)           # [R, V]
    all_emb = jnp.dot(onehot, emb_ref[...],
                      preferred_element_type=jnp.float32)      # [R, D]

    symbol = all_emb[:BL, :]                                   # [BL, D] token embeddings
    syn = all_emb[BL:, :]                                      # [K*BL, D] synonym embeddings

    # ---- i_sum = sum(symbol[i]): source indexes the *batch* axis with the position i
    #      (needs L <= B).  pos_mat is a constant matrix that sums each L-token batch
    #      group and broadcasts it to every token row in one tiny MXU matmul. ----
    ssum = jnp.dot(pos_ref[...], symbol,
                   preferred_element_type=jnp.float32)         # [BL, D]
    scale = jnp.sum(ssum, axis=1, keepdims=True)               # [BL, 1]

    # ---- symbol_from_synonyms = i_sum * sum_k e_k / sum(e_k) ----
    den = jnp.sum(syn, axis=1, keepdims=True)                  # [K*BL, 1] single XLU reduce
    inv = pl.reciprocal(den, approx=True)                      # EUP slot
    inv = inv * (2.0 - den * inv)                              # one Newton step (< 1e-7 rel err)
    norm = syn * inv                                           # [K*BL, D]
    acc = norm[0:BL, :]
    for k in range(1, K):                                      # K-1 dense VPU adds
        acc = acc + norm[k * BL:(k + 1) * BL, :]
    sfs = scale * acc                                          # [BL, D]
    # TODO(synk): torch.nn.Dropout(0.3) treated as identity (eval mode); a training
    # port would draw a mask with pltpu.prng_seed / pltpu.prng_random_bits.

    # ---- recovered = concat(symbol, padding) @ rev_weight, with the constant padding
    #      folded into a precomputed [1, Vr] bias (contraction dim halved, no concat) ----
    rec = jnp.dot(symbol, rev_ref[...],
                  preferred_element_type=jnp.float32) + bias_ref[...]   # [BL, Vr]

    # ---- one unmasked full-width lane-dense store ----
    pad_lanes = OUTW - D - Vr
    parts = [sfs, rec]
    if pad_lanes > 0:
        parts.append(jnp.zeros((BL, pad_lanes), jnp.float32))
    out_ref[...] = jnp.concatenate(parts, axis=1)


def test_module_forward(ids, emb_weight, rev_weight, padding, synonym_table):
    """TestModule.forward(ids) -> (recovered, symbol_from_synonyms)."""
    B, L = ids.shape
    V, D = emb_weight.shape
    K = synonym_table.shape[1]
    Vr = rev_weight.shape[1]
    A = rev_weight.shape[0] - D
    assert L <= B, "source indexes symbol[i] with the position index i; needs L <= B"
    BL = B * L
    OUTW = max(128, pl.cdiv(D + Vr, 128) * 128)          # lane-dense output slab width

    # token ids followed by synonym ids in k-major blocks: row (BL + k*BL + t)
    ids_flat = ids.reshape(BL).astype(jnp.int32)
    syn_ids = synonym_table.astype(jnp.int32)[ids_flat]              # [BL, K]
    all_ids = jnp.concatenate([ids_flat, syn_ids.T.reshape(-1)]).reshape(-1, 1)

    # constant matrix folding the "sum batch-row (t % L)" gather/broadcast
    t_idx = jnp.arange(BL, dtype=jnp.int32)
    s_idx = jnp.arange(BL, dtype=jnp.int32)
    pos_mat = ((s_idx[None, :] // L) == (t_idx[:, None] % L)).astype(jnp.float32)

    # TODO(synk): EmbeddingValue.symbol_padded lives in an external file
    # (VirtualEmbeddingV5); mirrored as concat(symbol, padding).  padding is uniform
    # (0.1 everywhere) per the module, so a single precomputed [1, Vr] bias is exact.
    bias = (padding[0, 0, :].astype(jnp.float32)
            @ rev_weight[D:, :].astype(jnp.float32)).reshape(1, Vr)
    rev_d = rev_weight[:D, :].astype(jnp.float32)

    kernel = functools.partial(_fused_forward_kernel,
                               BL=BL, D=D, K=K, V=V, Vr=Vr, OUTW=OUTW)
    # No grid: whole working set is a few KiB, one invocation avoids all per-step
    # overhead.  TODO(synk): at realistic sizes add a token-axis grid with
    # dimension_semantics=("parallel",) (2 TCs on v7x), budget VMEM <= ~48 MiB there
    # (or move emb to memory_space=pl.ANY with a manual DMA gather), and use 256-tall
    # M tiles / bf16 weights on v6e.
    out = pl.pallas_call(
        kernel,
        out_shape=jax.ShapeDtypeStruct((BL, OUTW), jnp.float32),
        in_specs=[
            pl.BlockSpec(memory_space=pltpu.MemorySpace.VMEM),   # all_ids
            pl.BlockSpec(memory_space=pltpu.MemorySpace.VMEM),   # pos_mat
            pl.BlockSpec(memory_space=pltpu.MemorySpace.VMEM),   # embedding weight
            pl.BlockSpec(memory_space=pltpu.MemorySpace.VMEM),   # reverse weight [:D]
            pl.BlockSpec(memory_space=pltpu.MemorySpace.VMEM),   # padding bias
        ],
        out_specs=pl.BlockSpec(memory_space=pltpu.MemorySpace.VMEM),
    )(all_ids, pos_mat, emb_weight.astype(jnp.float32), rev_d, bias)

    sfs = out[:, :D].reshape(B, L, D)
    recovered = out[:, D:D + Vr].reshape(B, L, Vr)
    return recovered, sfs


# ---------------------------------------------------------------------------
if __name__ == "__main__":
    # synthetic config / tokenizer constants
    V = 64     # tokenizer.max_id()
    Vr = 64    # tokenizer.max_voca_id()
    D = 32     # config.voca_embed_dim
    A = 32     # config.additional_context_dim
    B = 4      # config.num_batches
    L = 4      # config.context_len  (L <= B required by the source's symbol[i])
    K = 4      # synonyms per id (synthetic tokenizer)

    key = jax.random.PRNGKey(0)
    k_emb, k_rev, k_ids = jax.random.split(key, 3)
    # positive embedding weights keep sum(synonym_embedding) denominators away from 0
    emb_weight = jax.random.uniform(k_emb, (V, D), jnp.float32, 0.5, 1.5)
    # ReverseEmbedding weight: [D + A, Vr] so shapes compose with symbol_padded
    rev_weight = jax.random.normal(k_rev, (D + A, Vr), jnp.float32) * 0.05
    # self.padding = 0.1 everywhere, shape [num_batches, context_len, additional_context_dim]
    padding = jnp.full((B, L, A), 0.1, jnp.float32)
    ids = jax.random.randint(k_ids, (B, L), 0, V, jnp.int32)
    # synthetic tokenizer.id_to_synonym_id: K deterministic synonyms per id
    vv = jnp.arange(V, dtype=jnp.int32)[:, None]
    kk = jnp.arange(K, dtype=jnp.int32)[None, :]
    synonym_table = (vv * 7 + kk * 13 + 1) % V                    # [V, K]

    recovered, sfs = jax.jit(test_module_forward)(
        ids, emb_weight, rev_weight, padding, synonym_table)
    jax.block_until_ready((recovered, sfs))

    # pure-JAX reference check
    symbol = emb_weight[ids]
    syn_emb = emb_weight[synonym_table[ids]]
    i_sum = jnp.sum(symbol, axis=(1, 2))[:L]                      # sum(symbol[i])
    ref_sfs = i_sum[None, :, None] * jnp.sum(
        syn_emb / jnp.sum(syn_emb, axis=-1, keepdims=True), axis=2)
    ref_rec = jnp.concatenate([symbol, padding], axis=2) @ rev_weight
    assert recovered.shape == (B, L, Vr) and sfs.shape == (B, L, D)
    assert jnp.allclose(sfs, ref_sfs, rtol=1e-4, atol=1e-4)
    assert jnp.allclose(recovered, ref_rec, rtol=1e-4, atol=1e-4)
    print("KERNEL_OK")
</pallas_src>

<mosaic_0001>
module attributes {stable_mosaic.version = 11 : i64} {
  func.func @_fused_forward_kernel(%arg0: memref<80x1xi32, #tpu.memory_space<vmem>>, %arg1: memref<16x16xf32, #tpu.memory_space<vmem>>, %arg2: memref<64x32xf32, #tpu.memory_space<vmem>>, %arg3: memref<32x64xf32, #tpu.memory_space<vmem>>, %arg4: memref<1x64xf32, #tpu.memory_space<vmem>>, %arg5: memref<16x128xf32, #tpu.memory_space<vmem>>) attributes {dimension_semantics = [], scalar_prefetch = 0 : i64, scratch_operands = 0 : i64, tpu.core_type = #tpu.core_type<tc>} {
    %c0 = arith.constant 0 : index
    %c0_0 = arith.constant 0 : index
    %0 = vector.load %arg0[%c0, %c0_0] : memref<80x1xi32, #tpu.memory_space<vmem>>, vector<80x1xi32>
    %1 = tpu.iota {dimensions = array<i32: 1>} : vector<80x64xi32>
    %2 = vector.broadcast %0 : vector<80x1xi32> to vector<80x64xi32>
    %3 = arith.cmpi eq, %1, %2 : vector<80x64xi32>
    %4 = arith.extui %3 : vector<80x64xi1> to vector<80x64xi32>
    %5 = arith.sitofp %4 : vector<80x64xi32> to vector<80x64xf32>
    %c0_1 = arith.constant 0 : index
    %c0_2 = arith.constant 0 : index
    %6 = vector.load %arg2[%c0_1, %c0_2] : memref<64x32xf32, #tpu.memory_space<vmem>>, vector<64x32xf32>
    %cst = arith.constant dense<0.000000e+00> : vector<80x32xf32>
    %7 = tpu.matmul %5, %6, %cst {dimension_numbers = #tpu.dot_dimension_numbers<[1], [0], [0], [1], [0, 0, 1, 1], [], []>} : vector<80x64xf32>, vector<64x32xf32>, vector<80x32xf32> -> vector<80x32xf32>
    %8 = vector.extract_strided_slice %7 {offsets = [0, 0], sizes = [16, 32], strides = [1, 1]} : vector<80x32xf32> to vector<16x32xf32>
    %9 = vector.extract_strided_slice %7 {offsets = [16, 0], sizes = [64, 32], strides = [1, 1]} : vector<80x32xf32> to vector<64x32xf32>
    %c0_3 = arith.constant 0 : index
    %c0_4 = arith.constant 0 : index
    %10 = vector.load %arg1[%c0_3, %c0_4] : memref<16x16xf32, #tpu.memory_space<vmem>>, vector<16x16xf32>
    %cst_5 = arith.constant dense<0.000000e+00> : vector<16x32xf32>
    %11 = tpu.matmul %10, %8, %cst_5 {dimension_numbers = #tpu.dot_dimension_numbers<[1], [0], [0], [1], [0, 0, 1, 1], [], []>} : vector<16x16xf32>, vector<16x32xf32>, vector<16x32xf32> -> vector<16x32xf32>
    %cst_6 = arith.constant dense<0.000000e+00> : vector<16xf32>
    %12 = vector.multi_reduction <add>, %11, %cst_6 [1] : vector<16x32xf32> to vector<16xf32>
    %13 = vector.shape_cast %12 : vector<16xf32> to vector<16x1xf32>
    %cst_7 = arith.constant dense<0.000000e+00> : vector<64xf32>
    %14 = vector.multi_reduction <add>, %9, %cst_7 [1] : vector<64x32xf32> to vector<64xf32>
    %15 = vector.shape_cast %14 : vector<64xf32> to vector<64x1xf32>
    %16 = tpu.reciprocal %15 {approx = true} : vector<64x1xf32> -> vector<64x1xf32>
    %17 = arith.mulf %15, %16 : vector<64x1xf32>
    %cst_8 = arith.constant 2.000000e+00 : f32
    %18 = vector.broadcast %cst_8 : f32 to vector<64x1xf32>
    %19 = arith.subf %18, %17 : vector<64x1xf32>
    %20 = arith.mulf %16, %19 : vector<64x1xf32>
    %21 = vector.broadcast %20 : vector<64x1xf32> to vector<64x32xf32>
    %22 = arith.mulf %9, %21 : vector<64x32xf32>
    %23 = vector.extract_strided_slice %22 {offsets = [0, 0], sizes = [16, 32], strides = [1, 1]} : vector<64x32xf32> to vector<16x32xf32>
    %24 = vector.extract_strided_slice %22 {offsets = [16, 0], sizes = [16, 32], strides = [1, 1]} : vector<64x32xf32> to vector<16x32xf32>
    %25 = arith.addf %23, %24 : vector<16x32xf32>
    %26 = vector.extract_strided_slice %22 {offsets = [32, 0], sizes = [16, 32], strides = [1, 1]} : vector<64x32xf32> to vector<16x32xf32>
    %27 = arith.addf %25, %26 : vector<16x32xf32>
    %28 = vector.extract_strided_slice %22 {offsets = [48, 0], sizes = [16, 32], strides = [1, 1]} : vector<64x32xf32> to vector<16x32xf32>
    %29 = arith.addf %27, %28 : vector<16x32xf32>
    %30 = vector.broadcast %13 : vector<16x1xf32> to vector<16x32xf32>
    %31 = arith.mulf %30, %29 : vector<16x32xf32>
    %c0_9 = arith.constant 0 : index
    %c0_10 = arith.constant 0 : index
    %32 = vector.load %arg3[%c0_9, %c0_10] : memref<32x64xf32, #tpu.memory_space<vmem>>, vector<32x64xf32>
    %cst_11 = arith.constant dense<0.000000e+00> : vector<16x64xf32>
    %33 = tpu.matmul %8, %32, %cst_11 {dimension_numbers = #tpu.dot_dimension_numbers<[1], [0], [0], [1], [0, 0, 1, 1], [], []>} : vector<16x32xf32>, vector<32x64xf32>, vector<16x64xf32> -> vector<16x64xf32>
    %c0_12 = arith.constant 0 : index
    %c0_13 = arith.constant 0 : index
    %34 = vector.load %arg4[%c0_12, %c0_13] : memref<1x64xf32, #tpu.memory_space<vmem>>, vector<1x64xf32>
    %35 = vector.broadcast %34 : vector<1x64xf32> to vector<16x64xf32>
    %36 = arith.addf %33, %35 : vector<16x64xf32>
    %cst_14 = arith.constant 0.000000e+00 : f32
    %37 = vector.broadcast %cst_14 : f32 to vector<16x32xf32>
    %38 = tpu.concatenate %31, %36, %37 in 1 : vector<16x32xf32>, vector<16x64xf32>, vector<16x32xf32> -> vector<16x128xf32>
    %c0_15 = arith.constant 0 : index
    %c0_16 = arith.constant 0 : index
    %39 = vector.load %arg5[%c0_15, %c0_16] : memref<16x128xf32, #tpu.memory_space<vmem>>, vector<16x128xf32>
    tpu.vector_store %arg5[%c0_15, %c0_16], %38 {strides = array<i32>} : memref<16x128xf32, #tpu.memory_space<vmem>>, vector<16x128xf32>,
    return
  }
}

</mosaic_0001>

<bundles_post_ra>
// kernel: test_module_forward.1
= control target key start
LH: loop header
LB: loop body
LE: loop exit
PB: predicated region body
PF: predicated region fallthrough
CT: control target
= control target key end

     0   :  { %v659_v0 = vmov 0   ;;  %v30_v19 = vlaneseq  ;;  %vm100_vm0 = vcmask 523264   ;;  %v660_v23 = vmov 0.0   ;;  %s661_s14 = smov 32   ;;  %s829_s0 = inlined_call_operand.vmem [shape: s32[80,1], index: 0, kind: input, shape index: {}]   ;;  %s830_s2 = inlined_call_operand.vmem [shape: f32[64,32], index: 2, kind: input, shape index: {}]   ;;  %s831_s1 = inlined_call_operand.vmem [shape: f32[16,16], index: 1, kind: input, shape index: {}]   ;;  %s832_s3 = inlined_call_operand.vmem [shape: f32[32,64], index: 3, kind: input, shape index: {}]   ;;  %s833_s4 = inlined_call_operand.vmem [shape: f32[1,64], index: 4, kind: input, shape index: {}]   ;;  %s834_s5 = inlined_call_operand.vmem [shape: f32[16,128], index: 5, kind: output, shape index: {}]  }
   0x1   :  { %641 = vset.pattern.permute.xlu0 %v659_v0  ;;  %642 = vset.pattern.permute.xlu1 %v659_v0  ;;  %v20_v1 = vld [vmem:[%s829_s0] sm:$0xff]  ;;  %v22_v2 = vld [vmem:[%s829_s0 + $0x10] sm:$0xff]  ;;  %v21_v3 = vld [vmem:[%s829_s0 + $0x8] sm:$0xff]  ;;  %vm248_vm11 = vcmask 130048   ;;  %vm330_vm12 = vcmask 261120   ;;  %vm511_vm13 = vcmask 785408  }
   0x2   :  { %33 = vperm.xlu0 %641, %v20_v1   ;;  %39 = vperm.xlu1 %642, %v22_v2   ;;  %v23_v4 = vld [vmem:[%s829_s0 + $0x18] sm:$0xff]  ;;  %v98_v6 = vld [vmem:[%s830_s2 + $0x30] sm:$0xff]  ;;  %v24_v7 = vld [vmem:[%s829_s0 + $0x20] sm:$0xff]  ;;  %v31_v20 = vand.u32 127, %v30_v19 }
   0x3   :  { %v99_v5 = vld [vmem:[%s830_s2 + $0x38] sm:$0xff]  ;;  %v25_v8 = vld [vmem:[%s829_s0 + $0x28] sm:$0xff]  ;;  %v96_v10 = vld [vmem:[%s830_s2 + $0x20] sm:$0xff] }
   0x4   :  { %573 = vmatprep.subr.mxu0 %v99_v5  ;;  %622 = vmatprep.subr.mxu1 %v99_v5  ;;  %v97_v9 = vld [vmem:[%s830_s2 + $0x28] sm:$0xff]  ;;  %v26_v11 = vld [vmem:[%s829_s0 + $0x30] sm:$0xff]  ;;  %v27_v12 = vld [vmem:[%s829_s0 + $0x38] sm:$0xff] }
   0x5   :  { %574 = vmatpush3.msra.mxu0 %v99_v5  ;;  %630 = vmatpush3.msra.mxu1 %v99_v5  ;;  %v95_v13 = vld [vmem:[%s830_s2 + $0x18] sm:$0xff]  ;;  %v28_v14 = vld [vmem:[%s829_s0 + $0x40] sm:$0xff]  ;;  %v29_v15 = vld [vmem:[%s829_s0 + $0x48] sm:$0xff] }
   0x6   :  { %36 = vperm.xlu0 %641, %v21_v3   ;;  %42 = vperm.xlu1 %642, %v23_v4   ;;  %v94_v16 = vld [vmem:[%s830_s2 + $0x10] sm:$0xff]  ;;  %v93_v17 = vld [vmem:[%s830_s2 + $0x8] sm:$0xff]  ;;  %v92_v18 = vld [vmem:[%s830_s2] sm:$0xff] }
   0x7   :  { %575 = vmatprep.subr.mxu0 %v98_v6  ;;  %623 = vmatprep.subr.mxu1 %v98_v6  ;;  %v246_v42 = vld [vmem:[%s831_s1] sm:$0xff]  ;;  %v247_v45 = vld [vmem:[%s831_s1 + $0x8] sm:$0xff]  ;;  %v412_v46 = vld [vmem:[%s832_s3 + $0x18] sm:$0xff] }
   0x8   :  { %576 = vmatpush3.msra.mxu0 %v98_v6  ;;  %631 = vmatpush3.msra.mxu1 %v98_v6  ;;  %v411_v48 = vld [vmem:[%s832_s3 + $0x10] sm:$0xff]  ;;  %v410_v50 = vld [vmem:[%s832_s3 + $0x8] sm:$0xff]  ;;  %v409_v53 = vld [vmem:[%s832_s3] sm:$0xff] }
   0x9   :  { %577 = vmatprep.subr.mxu0 %v97_v9  ;;  %624 = vmatprep.subr.mxu1 %v97_v9 }
   0xa   :  { %45 = vperm.xlu0 %641, %v24_v7   ;;  %48 = vperm.xlu1 %642, %v25_v8   ;;  %v542_v8 = vld [vmem:[%s833_s4] ss:$0 sm:$0xff] }
   0xb   :  { %578 = vmatpush3.msra.mxu0 %v97_v9  ;;  %632 = vmatpush3.msra.mxu1 %v97_v9 }
   0xc   :  { %579 = vmatprep.subr.mxu0 %v96_v10  ;;  %625 = vmatprep.subr.mxu1 %v96_v10 }
   0xd   :  { %580 = vmatpush3.msra.mxu0 %v96_v10  ;;  %633 = vmatpush3.msra.mxu1 %v96_v10 }
   0xe   :  { %51 = vperm.xlu0 %641, %v26_v11   ;;  %54 = vperm.xlu1 %642, %v27_v12  }
   0xf   :  { %581 = vmatprep.subr.mxu0 %v95_v13  ;;  %626 = vmatprep.subr.mxu1 %v95_v13 }
  0x10   :  { %582 = vmatpush3.msra.mxu0 %v95_v13  ;;  %634 = vmatpush3.msra.mxu1 %v95_v13 }
  0x11   :  { %583 = vmatprep.subr.mxu0 %v94_v16  ;;  %627 = vmatprep.subr.mxu1 %v94_v16 }
  0x12   :  { %57 = vperm.xlu0 %641, %v28_v14   ;;  %60 = vperm.xlu1 %642, %v29_v15  }
  0x13   :  { %584 = vmatpush3.msra.mxu0 %v94_v16  ;;  %635 = vmatpush3.msra.mxu1 %v94_v16 }
  0x14   :  { %585 = vmatprep.subr.mxu0 %v93_v17  ;;  %628 = vmatprep.subr.mxu1 %v93_v17 }
  0x15   :  { %586 = vmatpush3.msra.mxu0 %v93_v17  ;;  %636 = vmatpush3.msra.mxu1 %v93_v17 }
  0x16   :  { %587 = vmatprep.subr.mxu0 %v92_v18  ;;  %629 = vmatprep.subr.mxu1 %v92_v18 }
  0x17   :  { %588 = vmatpush3.msra.mxu0 %v92_v18  ;;  %637 = vmatpush3.msra.mxu1 %v92_v18 }
  0x7d   :  { %v34_v21 = vpop.permute.xlu0 %33  ;;  %v40_v22 = vpop.permute.xlu1 %39 }
  0x7e   :  { %vm62_vm1 = vcmp.eq.s32.totalorder %v31_v20, %v34_v21  ;;  %vm64_vm2 = vcmp.eq.s32.totalorder %v31_v20, %v40_v22 }
  0x7f   :  { %v520_v24 = vsel %vm62_vm1, 1.0, %v660_v23  ;;  %v522_v27 = vsel %vm64_vm2, 1.0, %v660_v23 }
  0x80   :  { %589 = vmatprep.mubr.msk.f32.mxu0 %vm100_vm0, %v520_v24 }
  0x81   :  { %v37_v25 = vpop.permute.xlu0 %36  ;;  %v43_v26 = vpop.permute.xlu1 %42 }
  0x82   :  { %vm63_vm3 = vcmp.eq.s32.totalorder %v31_v20, %v37_v25  ;;  %vm65_vm4 = vcmp.eq.s32.totalorder %v31_v20, %v43_v26 }
  0x83   :  { %v521_v28 = vsel %vm63_vm3, 1.0, %v660_v23  ;;  %v523_v29 = vsel %vm65_vm4, 1.0, %v660_v23 }
  0x84   :  { %590 = vmatmul.mubr.msk.f32.vlgmr.msra.gmra.mxu0 %vm100_vm0, %v521_v28 }
  0x85   :  { %v46_v30 = vpop.permute.xlu0 %45  ;;  %v49_v31 = vpop.permute.xlu1 %48  ;;  %592 = vmatprep.mubr.msk.f32.mxu0 %vm100_vm0, %v522_v27 }
  0x86   :  { %vm66_vm5 = vcmp.eq.s32.totalorder %v31_v20, %v46_v30  ;;  %vm67_vm6 = vcmp.eq.s32.totalorder %v31_v20, %v49_v31 }
  0x87   :  { %v524_v32 = vsel %vm66_vm5, 1.0, %v660_v23  ;;  %v525_v33 = vsel %vm67_vm6, 1.0, %v660_v23 }
  0x88   :  { %593 = vmatmul.mubr.msk.f32.gmra.mxu0 %vm100_vm0, %v523_v29 }
  0x89   :  { %595 = vmatprep.mubr.msk.f32.mxu0 %vm100_vm0, %v524_v32  ;;  %v52_v34 = vpop.permute.xlu0 %51  ;;  %v55_v35 = vpop.permute.xlu1 %54 }
  0x8a   :  { %vm68_vm7 = vcmp.eq.s32.totalorder %v31_v20, %v52_v34  ;;  %vm69_vm8 = vcmp.eq.s32.totalorder %v31_v20, %v55_v35 }
  0x8b   :  { %v526_v36 = vsel %vm68_vm7, 1.0, %v660_v23  ;;  %v527_v37 = vsel %vm69_vm8, 1.0, %v660_v23 }
  0x8c   :  { %596 = vmatmul.mubr.msk.f32.gmra.mxu0 %vm100_vm0, %v525_v33 }
  0x8d   :  { %598 = vmatprep.mubr.msk.f32.mxu0 %vm100_vm0, %v526_v36  ;;  %v58_v38 = vpop.permute.xlu0 %57  ;;  %v61_v39 = vpop.permute.xlu1 %60 }
  0x8e   :  { %vm70_vm9 = vcmp.eq.s32.totalorder %v31_v20, %v58_v38  ;;  %vm71_vm10 = vcmp.eq.s32.totalorder %v31_v20, %v61_v39 }
  0x8f   :  { %v529_v40 = vsel %vm71_vm10, 1.0, %v660_v23  ;;  %v528_v41 = vsel %vm70_vm9, 1.0, %v660_v23 }
  0x90   :  { %601 = vmatprep.mubr.msk.f32.mxu1 %vm100_vm0, %v528_v41  ;;  %599 = vmatmul.mubr.msk.f32.gmra.mxu0 %vm100_vm0, %v527_v37 }
  0x91   :  { %602 = vmatmul.mubr.msk.f32.vlgmr.msra.gmra.mxu1 %vm100_vm0, %v529_v40 }
  0x92   :  { %608 = vmatprep.mubr.msk.f32.mxu1 %vm248_vm11, %v246_v42 }
 0x144   :  { %v591_v43 = vpop.f32.mrf.mxu0 }
 0x145   :  { %604 = vmatprep.subr.mxu1 %v591_v43 }
 0x146   :  { %v197_v44 = vpop.f32.mrf.mxu0  ;;  %605 = vmatpush3.msra.mxu1 %v591_v43 }
 0x147   :  { %606 = vmatprep.subr.mxu1 %v197_v44 }
 0x148   :  { %v765_v47 = vpop.f32.mrf.mxu0  ;;  %607 = vmatpush3.msra.mxu1 %v197_v44 }
 0x149   :  { %609 = vmatmul.mubr.msk.f32.vlgmr.msra.gmra.mxu1 %vm248_vm11, %v247_v45  ;;  %611 = vmatprep.subr.mxu1 %v412_v46  ;;  %v340_v62 = vsel %vm330_vm12, %v765_v47, 0.0 }
 0x14a   :  { %v770_v49 = vpop.f32.mrf.mxu0  ;;  %612 = vmatpush3.msra.mxu1 %v412_v46  ;;  %619 = vmatprep.mubr.msk.f32.mxu1 %vm330_vm12, %v197_v44 }
 0x14b   :  { %613 = vmatprep.subr.mxu1 %v411_v48  ;;  %v337_v51 = vsel %vm330_vm12, %v770_v49, 0.0 }
 0x14c   :  { %338 = vadd.xlane.f32.xlu0 %v337_v51  ;;  %614 = vmatpush3.msra.mxu1 %v411_v48  ;;  %v778_v52 = vpop.f32.mrf.mxu0 }
 0x14d   :  { %615 = vmatprep.subr.mxu1 %v410_v50  ;;  %v346_v54 = vsel %vm330_vm12, %v778_v52, 0.0 }
 0x14e   :  { %616 = vmatpush3.msra.mxu1 %v410_v50  ;;  %v785_v55 = vpop.f32.mrf.mxu0 }
 0x14f   :  { %617 = vmatprep.subr.mxu1 %v409_v53  ;;  %v343_v57 = vsel %vm330_vm12, %v785_v55, 0.0 }
 0x150   :  { %347 = vadd.xlane.f32.xlu0 %v346_v54  ;;  %618 = vmatpush3.msra.mxu1 %v409_v53  ;;  %v792_v58 = vpop.f32.mrf.mxu0 }
 0x151   :  { %v787_v56 = vpop.f32.mrf.mxu1  ;;  %620 = vmatmul.mubr.msk.f32.vlgmr.msra.gmra.mxu1 %vm330_vm12, %v591_v43  ;;  %v352_v61 = vsel %vm330_vm12, %v792_v58, 0.0 }
 0x152   :  { %v802_v63 = vpop.f32.mrf.mxu0  ;;  %v358_v0 = vsel %vm330_vm12, %v787_v56, 0.0 }
 0x153   :  { %v794_v59 = vpop.f32.mrf.mxu1  ;;  %v349_v1 = vsel %vm330_vm12, %v802_v63, 0.0 }
 0x154   :  { %344 = vadd.xlane.f32.xlu0 %v343_v57  ;;  %v355_v60 = vsel %vm330_vm12, %v794_v59, 0.0 }
 0x155   :  { %356 = vadd.xlane.f32.xlu1 %v355_v60 }
 0x158   :  { %353 = vadd.xlane.f32.xlu0 %v352_v61 }
 0x159   :  { %341 = vadd.xlane.f32.xlu1 %v340_v62 }
 0x15c   :  { %359 = vadd.xlane.f32.xlu0 %v358_v0 }
 0x15d   :  { %350 = vadd.xlane.f32.xlu1 %v349_v1 }
 0x1d5   :  { %v339_v11 = vpop.xlane.xlu0 %338 }
 0x1d9   :  { %v348_v12 = vpop.xlane.xlu0 %347 }
 0x1dd   :  { %v345_v14 = vpop.xlane.xlu0 %344 }
 0x1de   :  { %v357_v13 = vpop.xlane.xlu1 %356 }
 0x1e1   :  { %v354_v16 = vpop.xlane.xlu0 %353 }
 0x1e2   :  { %v342_v15 = vpop.xlane.xlu1 %341 }
 0x1e3   :  { %643 = vrcp.f32 %v342_v15 }
 0x1e4   :  { %645 = vrcp.f32 %v348_v12 }
 0x1e5   :  { %647 = vrcp.f32 %v339_v11  ;;  %v360_v18 = vpop.xlane.xlu0 %359 }
 0x1e6   :  { %v351_v17 = vpop.xlane.xlu1 %350  ;;  %649 = vrcp.f32 %v345_v14 }
 0x1e7   :  { %651 = vrcp.f32 %v354_v16 }
 0x1e8   :  { %653 = vrcp.f32 %v351_v17 }
 0x1e9   :  { %655 = vrcp.f32 %v360_v18 }
 0x1ea   :  { %657 = vrcp.f32 %v357_v13 }
 0x1f0   :  { %v644_v19 = vpop.eup %643 }
 0x1f1   :  { %v646_v20 = vpop.eup %645  ;;  %v370_v22 = vmul.f32 %v644_v19, %v342_v15 }
 0x1f2   :  { %v648_v21 = vpop.eup %647  ;;  %v372_v25 = vmul.f32 %v646_v20, %v348_v12 }
 0x1f3   :  { %v650_v23 = vpop.eup %649  ;;  %v378_v28 = vsub.f32 2.0, %v370_v22  ;;  %v369_v30 = vmul.f32 %v648_v21, %v339_v11 }
 0x1f4   :  { %v652_v24 = vpop.eup %651  ;;  %v371_v27 = vmul.f32 %v650_v23, %v345_v14  ;;  %v380_v31 = vsub.f32 2.0, %v372_v25 }
 0x1f5   :  { %v654_v26 = vpop.eup %653  ;;  %v374_v32 = vmul.f32 %v652_v24, %v354_v16  ;;  %v386_v35 = vmul.f32 %v644_v19, %v378_v28  ;;  %v377_v38 = vsub.f32 2.0, %v369_v30 }
 0x1f6   :  { %v656_v29 = vpop.eup %655  ;;  %v373_v33 = vmul.f32 %v654_v26, %v351_v17  ;;  %v379_v34 = vsub.f32 2.0, %v371_v27  ;;  %v388_v39 = vmul.f32 %v646_v20, %v380_v31 }
 0x1f7   :  { %v376_v36 = vmul.f32 %v656_v29, %v360_v18  ;;  %v658_v37 = vpop.eup %657  ;;  %v382_v40 = vsub.f32 2.0, %v374_v32  ;;  %v394_v44 = vmul.f32 %v765_v47, %v386_v35  ;;  %v385_v46 = vmul.f32 %v648_v21, %v377_v38 }
 0x1f8   :  { %v381_v41 = vsub.f32 2.0, %v373_v33  ;;  %v387_v42 = vmul.f32 %v650_v23, %v379_v34  ;;  %v375_v43 = vmul.f32 %v658_v37, %v357_v13  ;;  %v396_v48 = vmul.f32 %v778_v52, %v388_v39 }
 0x1f9   :  { %v384_v45 = vsub.f32 2.0, %v376_v36  ;;  %v390_v50 = vmul.f32 %v652_v24, %v382_v40  ;;  %v393_v61 = vmul.f32 %v385_v46, %v770_v49 }
 0x1fa   :  { %v389_v51 = vmul.f32 %v654_v26, %v381_v41  ;;  %v395_v53 = vmul.f32 %v387_v42, %v785_v55  ;;  %v383_v54 = vsub.f32 2.0, %v375_v43  ;;  %v402_v60 = vadd.f32 %v396_v48, %v394_v44 }
 0x1fb   :  { %v392_v57 = vmul.f32 %v656_v29, %v384_v45  ;;  %v398_v62 = vmul.f32 %v792_v58, %v390_v50 }
 0x1fc   :  { %v397_v0 = vmul.f32 %v389_v51, %v802_v63  ;;  %v391_v1 = vmul.f32 %v658_v37, %v383_v54 }
 0x1fd   :  { %v400_v47 = vmul.f32 %v787_v56, %v392_v57 }
 0x209   :  { %v610_v2 = vpop.f32.mrf.mxu1 }
 0x20a   :  { %v334_v3 = vsel %vm330_vm12, %v610_v2, 0.0  ;;  %v404_v2 = vadd.f32 %v402_v60, %v398_v62 }
 0x20b   :  { %335 = vadd.xlane.f32.xlu0 %v334_v3  ;;  %v321_v4 = vpop.f32.mrf.mxu1  ;;  %v401_v3 = vadd.f32 %v395_v53, %v393_v61 }
 0x20c   :  { %v331_v5 = vsel %vm330_vm12, %v321_v4, 0.0 }
 0x20d   :  { %332 = vadd.xlane.f32.xlu1 %v331_v5  ;;  %v403_v4 = vadd.f32 %v401_v3, %v397_v0  ;;  %v406_v5 = vadd.f32 %v404_v2, %v400_v47 }
 0x211   :  { %v621_v6 = vpop.f32.mrf.mxu1 }
 0x212   :  { %v498_v10 = vadd.f32 %v621_v6, %v542_v8  ;;  %v399_v6 = vmul.f32 %v391_v1, %v794_v59 }
 0x213   :  { %v492_v7 = vpop.f32.mrf.mxu1 }
 0x214   :  { %v493_v9 = vadd.f32 %v542_v8, %v492_v7  ;;  %v405_v8 = vadd.f32 %v403_v4, %v399_v6 }
 0x21e   :  { %503 = vrot.lane.b32.xlu1 %v493_v9, %s661_s14 }
 0x221   :  { %505 = vrot.lane.b32.xlu0 %v498_v10, %s661_s14 }
 0x294   :  { %v336_v52 = vpop.xlane.xlu0 %335 }
 0x295   :  { %v408_v7 = vmul.f32 %v406_v5, %v336_v52 }
 0x296   :  { %v333_v55 = vpop.xlane.xlu1 %332 }
 0x297   :  { %v407_v49 = vmul.f32 %v405_v8, %v333_v55 }
 0x298   :  { %v506_v9 = vpop.permute.xlu0 %505 }
 0x299   :  { %v510_v58 = vsel %vm330_vm12, %v408_v7, %v506_v9 }
 0x29a   :  { %v513_v10 = vsel %vm511_vm13, %v510_v58, 0.0  ;;  %v504_v63 = vpop.permute.xlu1 %503 }
 0x29b   :  { %515 = vst [vmem:[%s834_s5 + $0x8] sm:$0xff] %v513_v10  ;;  %v509_v56 = vsel %vm330_vm12, %v407_v49, %v504_v63 }
 0x29c   :  { %v512_v11 = vsel %vm511_vm13, %v509_v56, 0.0 }
 0x29d   :  { %514 = vst [vmem:[%s834_s5] sm:$0xff] %v512_v11 }

</bundles_post_ra>
